<compile_context>
chip_gen: v7x
topology: tpu7x:2x2x1
jax: 0.10.0
libtpu: 0.0.40
codegen_flags: <defaults>
</compile_context>

<pallas_src>
import jax
import jax.numpy as jnp
from jax.experimental import pallas as pl
from jax.experimental.pallas import tpu as pltpu


# ---------------------------------------------------------------------------
# Kernel 1 (inference): linear1 -> relu -> linear2 -> relu -> linear3
#                       -> argmax(dim=-1).  Sigmoid is skipped (monotone),
#                       y_pred is never materialized in HBM.
# ---------------------------------------------------------------------------
def predict_kernel(x_ref, w1_ref, b1_ref, w2_ref, b2_ref, w3_ref, b3_ref,
                   pred_ref):
    x = x_ref[...]
    h1 = jnp.dot(x, w1_ref[...], preferred_element_type=jnp.float32) + b1_ref[...]
    h1 = jnp.maximum(h1, 0.0)                                   # relu
    h2 = jnp.dot(h1, w2_ref[...], preferred_element_type=jnp.float32) + b2_ref[...]
    h2 = jnp.maximum(h2, 0.0)                                   # relu
    logits = jnp.dot(h2, w3_ref[...], preferred_element_type=jnp.float32) + b3_ref[...]

    # argmax over last dim (first-max index, matching torch.argmax semantics)
    B, C = logits.shape
    col_ids = jax.lax.broadcasted_iota(jnp.int32, (B, C), 1)
    row_max = jnp.max(logits, axis=-1, keepdims=True)
    idx = jnp.min(jnp.where(logits == row_max, col_ids, C), axis=-1, keepdims=True)
    pred_ref[...] = idx.astype(jnp.int32)


# ---------------------------------------------------------------------------
# Kernel 2 (training): full MLP -> sigmoid -> CrossEntropyLoss, fused.
# torch's nn.CrossEntropyLoss applies log_softmax to its input (here the
# sigmoid outputs, exactly as the PyTorch module does) and averages NLL.
# Labels arrive as a (B, 1) int32 array; the picked activation is selected
# in-kernel with an iota == label compare (no one-hot matmul).
# Only the (1, 1) loss goes back to HBM.
# ---------------------------------------------------------------------------
def loss_kernel(x_ref, w1_ref, b1_ref, w2_ref, b2_ref, w3_ref, b3_ref,
                y_ref, loss_ref):
    x = x_ref[...]
    h1 = jnp.dot(x, w1_ref[...], preferred_element_type=jnp.float32) + b1_ref[...]
    h1 = jnp.maximum(h1, 0.0)                                   # relu
    h2 = jnp.dot(h1, w2_ref[...], preferred_element_type=jnp.float32) + b2_ref[...]
    h2 = jnp.maximum(h2, 0.0)                                   # relu
    logits = jnp.dot(h2, w3_ref[...], preferred_element_type=jnp.float32) + b3_ref[...]

    # sigmoid: reciprocal routed to the EUP slot (free filler next to the exp)
    z = pl.reciprocal(1.0 + jnp.exp(-logits), approx=True)      # (B, C)

    # CrossEntropy(z, y) == mean_b [ logsumexp(z_b) - z_b[y_b] ]
    B, C = z.shape
    m = jnp.max(z, axis=-1, keepdims=True)
    lse = m + jnp.log(jnp.sum(jnp.exp(z - m), axis=-1, keepdims=True))   # (B, 1)
    col_ids = jax.lax.broadcasted_iota(jnp.int32, (B, C), 1)
    picked_mask = col_ids == y_ref[...]                                  # (B, C)
    picked = jnp.sum(jnp.where(picked_mask, z, 0.0), axis=-1, keepdims=True)
    nll = lse - picked                                                   # (B, 1)
    loss_ref[...] = jnp.mean(nll, axis=0, keepdims=True)                 # (1, 1)


# ---------------------------------------------------------------------------
# Wrappers
# ---------------------------------------------------------------------------
def _vmem_spec():
    return pl.BlockSpec(memory_space=pltpu.MemorySpace.VMEM)


def torch_model_forward(x, params, y=None):
    """Reproduces TorchModel.forward.

    If y is None -> returns int32 class predictions of shape (B,)
                    (torch returns int64; value semantics identical).
    Else         -> returns scalar CrossEntropyLoss(sigmoid(logits), y).
    """
    w1, b1, w2, b2, w3, b3 = params
    B = x.shape[0]

    if y is None:
        pred = pl.pallas_call(
            predict_kernel,
            out_shape=jax.ShapeDtypeStruct((B, 1), jnp.int32),
            in_specs=[_vmem_spec()] * 7,
            out_specs=_vmem_spec(),
        )(x, w1, b1, w2, b2, w3, b3)
        return pred[:, 0]

    labels = y.astype(jnp.int32).reshape(B, 1)                  # free metadata reshape
    loss = pl.pallas_call(
        loss_kernel,
        out_shape=jax.ShapeDtypeStruct((1, 1), jnp.float32),
        in_specs=[_vmem_spec()] * 8,
        out_specs=_vmem_spec(),
    )(x, w1, b1, w2, b2, w3, b3, labels)
    return loss[0, 0]


def init_params(key, input_size):
    """Deterministic init. Weights stored (in, out); biases stored (1, out)."""
    ks = jax.random.split(key, 6)
    def lin(kw, kb, fan_in, fan_out):
        bound = 1.0 / jnp.sqrt(float(fan_in))
        w = jax.random.uniform(kw, (fan_in, fan_out), jnp.float32, -bound, bound)
        b = jax.random.uniform(kb, (1, fan_out), jnp.float32, -bound, bound)
        return w, b
    w1, b1 = lin(ks[0], ks[1], input_size, 10)
    w2, b2 = lin(ks[2], ks[3], 10, 10)
    w3, b3 = lin(ks[4], ks[5], 10, 5)
    return (w1, b1, w2, b2, w3, b3)


if __name__ == "__main__":
    input_size = 32
    batch = 8

    root = jax.random.PRNGKey(0)
    k_x, k_y, k_p = jax.random.split(root, 3)

    x = jax.random.normal(k_x, (batch, input_size), jnp.float32)
    y = jax.random.randint(k_y, (batch,), 0, 5, jnp.int32)
    params = init_params(k_p, input_size)

    # inference branch: argmax over (monotone) sigmoid outputs == argmax(logits)
    preds = torch_model_forward(x, params)
    # training branch: fused MLP + sigmoid + CrossEntropyLoss in one kernel
    loss = torch_model_forward(x, params, y)

    jax.block_until_ready(preds)
    jax.block_until_ready(loss)

    assert preds.shape == (batch,)
    assert loss.shape == ()
    print("KERNEL_OK")
</pallas_src>

<mosaic_0001>
module attributes {stable_mosaic.version = 11 : i64} {
  func.func @predict_kernel(%arg0: memref<8x32xf32, #tpu.memory_space<vmem>>, %arg1: memref<32x10xf32, #tpu.memory_space<vmem>>, %arg2: memref<1x10xf32, #tpu.memory_space<vmem>>, %arg3: memref<10x10xf32, #tpu.memory_space<vmem>>, %arg4: memref<1x10xf32, #tpu.memory_space<vmem>>, %arg5: memref<10x5xf32, #tpu.memory_space<vmem>>, %arg6: memref<1x5xf32, #tpu.memory_space<vmem>>, %arg7: memref<8x1xi32, #tpu.memory_space<vmem>>) attributes {dimension_semantics = [], scalar_prefetch = 0 : i64, scratch_operands = 0 : i64, tpu.core_type = #tpu.core_type<tc>} {
    %c0 = arith.constant 0 : index
    %c0_0 = arith.constant 0 : index
    %0 = vector.load %arg0[%c0, %c0_0] : memref<8x32xf32, #tpu.memory_space<vmem>>, vector<8x32xf32>
    %c0_1 = arith.constant 0 : index
    %c0_2 = arith.constant 0 : index
    %1 = vector.load %arg1[%c0_1, %c0_2] : memref<32x10xf32, #tpu.memory_space<vmem>>, vector<32x10xf32>
    %cst = arith.constant dense<0.000000e+00> : vector<8x10xf32>
    %2 = tpu.matmul %0, %1, %cst {dimension_numbers = #tpu.dot_dimension_numbers<[1], [0], [0], [1], [0, 0, 1, 1], [], []>} : vector<8x32xf32>, vector<32x10xf32>, vector<8x10xf32> -> vector<8x10xf32>
    %c0_3 = arith.constant 0 : index
    %c0_4 = arith.constant 0 : index
    %3 = vector.load %arg2[%c0_3, %c0_4] : memref<1x10xf32, #tpu.memory_space<vmem>>, vector<1x10xf32>
    %4 = vector.broadcast %3 : vector<1x10xf32> to vector<8x10xf32>
    %5 = arith.addf %2, %4 : vector<8x10xf32>
    %cst_5 = arith.constant 0.000000e+00 : f32
    %6 = vector.broadcast %cst_5 : f32 to vector<8x10xf32>
    %7 = arith.maximumf %5, %6 : vector<8x10xf32>
    %c0_6 = arith.constant 0 : index
    %c0_7 = arith.constant 0 : index
    %8 = vector.load %arg3[%c0_6, %c0_7] : memref<10x10xf32, #tpu.memory_space<vmem>>, vector<10x10xf32>
    %cst_8 = arith.constant dense<0.000000e+00> : vector<8x10xf32>
    %9 = tpu.matmul %7, %8, %cst_8 {dimension_numbers = #tpu.dot_dimension_numbers<[1], [0], [0], [1], [0, 0, 1, 1], [], []>} : vector<8x10xf32>, vector<10x10xf32>, vector<8x10xf32> -> vector<8x10xf32>
    %c0_9 = arith.constant 0 : index
    %c0_10 = arith.constant 0 : index
    %10 = vector.load %arg4[%c0_9, %c0_10] : memref<1x10xf32, #tpu.memory_space<vmem>>, vector<1x10xf32>
    %11 = vector.broadcast %10 : vector<1x10xf32> to vector<8x10xf32>
    %12 = arith.addf %9, %11 : vector<8x10xf32>
    %cst_11 = arith.constant 0.000000e+00 : f32
    %13 = vector.broadcast %cst_11 : f32 to vector<8x10xf32>
    %14 = arith.maximumf %12, %13 : vector<8x10xf32>
    %c0_12 = arith.constant 0 : index
    %c0_13 = arith.constant 0 : index
    %15 = vector.load %arg5[%c0_12, %c0_13] : memref<10x5xf32, #tpu.memory_space<vmem>>, vector<10x5xf32>
    %cst_14 = arith.constant dense<0.000000e+00> : vector<8x5xf32>
    %16 = tpu.matmul %14, %15, %cst_14 {dimension_numbers = #tpu.dot_dimension_numbers<[1], [0], [0], [1], [0, 0, 1, 1], [], []>} : vector<8x10xf32>, vector<10x5xf32>, vector<8x5xf32> -> vector<8x5xf32>
    %c0_15 = arith.constant 0 : index
    %c0_16 = arith.constant 0 : index
    %17 = vector.load %arg6[%c0_15, %c0_16] : memref<1x5xf32, #tpu.memory_space<vmem>>, vector<1x5xf32>
    %18 = vector.broadcast %17 : vector<1x5xf32> to vector<8x5xf32>
    %19 = arith.addf %16, %18 : vector<8x5xf32>
    %20 = tpu.iota {dimensions = array<i32: 1>} : vector<8x5xi32>
    %cst_17 = arith.constant dense<0xFF800000> : vector<8xf32>
    %21 = vector.multi_reduction <maximumf>, %19, %cst_17 [1] : vector<8x5xf32> to vector<8xf32>
    %22 = vector.shape_cast %21 : vector<8xf32> to vector<8x1xf32>
    %23 = vector.broadcast %22 : vector<8x1xf32> to vector<8x5xf32>
    %24 = arith.cmpf oeq, %19, %23 : vector<8x5xf32>
    %c5_i32 = arith.constant 5 : i32
    %25 = vector.broadcast %c5_i32 : i32 to vector<8x5xi32>
    %26 = arith.select %24, %20, %25 : vector<8x5xi1>, vector<8x5xi32>
    %cst_18 = arith.constant dense<2147483647> : vector<8xi32>
    %27 = vector.multi_reduction <minsi>, %26, %cst_18 [1] : vector<8x5xi32> to vector<8xi32>
    %28 = vector.shape_cast %27 : vector<8xi32> to vector<8x1xi32>
    %c0_19 = arith.constant 0 : index
    %c0_20 = arith.constant 0 : index
    %29 = vector.load %arg7[%c0_19, %c0_20] : memref<8x1xi32, #tpu.memory_space<vmem>>, vector<8x1xi32>
    tpu.vector_store %arg7[%c0_19, %c0_20], %28 {strides = array<i32>} : memref<8x1xi32, #tpu.memory_space<vmem>>, vector<8x1xi32>,
    return
  }
}

</mosaic_0001>

<bundles_post_ra>
// kernel: tpu_custom_call.1
= control target key start
LH: loop header
LB: loop body
LE: loop exit
PB: predicated region body
PF: predicated region fallthrough
CT: control target
= control target key end

     0   :  { %v377_v0 = vmov 0.0|0.0   ;;  %vm378_vm0 = vmmov 0   ;;  %v379_v4 = vmov 0.0   ;;  %vm38_vm1 = vcmask 261120   ;;  %s471_s1 = inlined_call_operand.vmem [shape: f32[32,10], index: 1, kind: input, shape index: {}]   ;;  %s472_s0 = inlined_call_operand.vmem [shape: f32[8,32], index: 0, kind: input, shape index: {}]   ;;  %s473_s3 = inlined_call_operand.vmem [shape: f32[10,10], index: 3, kind: input, shape index: {}]   ;;  %s474_s2 = inlined_call_operand.vmem [shape: f32[1,10], index: 2, kind: input, shape index: {}]   ;;  %s475_s5 = inlined_call_operand.vmem [shape: f32[10,5], index: 5, kind: input, shape index: {}]   ;;  %s476_s4 = inlined_call_operand.vmem [shape: f32[1,10], index: 4, kind: input, shape index: {}]   ;;  %s477_s6 = inlined_call_operand.vmem [shape: f32[1,5], index: 6, kind: input, shape index: {}]   ;;  %s478_s7 = inlined_call_operand.vmem [shape: s32[8,1], index: 7, kind: output, shape index: {}]  }
   0x1   :  { %359 = vmatprep.subr.bf16.mxu0 %v377_v0  ;;  %v27_v1 = vld [vmem:[%s471_s1] sm:$0xff]  ;;  %v28_v2 = vld [vmem:[%s471_s1 + $0x8] sm:$0xff]  ;;  %v29_v3 = vld [vmem:[%s471_s1 + $0x10] sm:$0xff]  ;;  %342 = vmatprep.mubr.msk.f32.mxu0 %vm378_vm0, %v379_v4  ;;  %vm126_vm2 = vcmask 1041408   ;;  %vm380_vm3 = vmmov 1   ;;  %vm122_vm5 = vcmask 80896   ;;  %v286_v31 = vlaneseq }
   0x2   :  { %v360_v5 = vpack.c.bf16 %v28_v2, %v27_v1  ;;  %v30_v6 = vld [vmem:[%s471_s1 + $0x18] sm:$0xff]  ;;  %365 = vmatprep.subr.bf16.mxu1 %v377_v0  ;;  %349 = vmatprep.mubr.msk.f32.mxu1 %vm378_vm0, %v379_v4  ;;  %v26_v8 = vld [vmem:[%s472_s0] sm:$0xff]  ;;  %v114_v10 = vld [vmem:[%s473_s3 + $0x8] sm:$0x3]  ;;  %vm288_vm6 = vcmask 39936   ;;  %vm309_vm9 = vcmask 7168  }
   0x3   :  { %v363_v7 = vpack.c.bf16 %v30_v6, %v29_v3  ;;  %v113_v9 = vld [vmem:[%s473_s3] sm:$0xff]  ;;  %vm444_vm4 = vmpackc.low %vm126_vm2, %vm380_vm3  ;;  %v202_v19 = vld [vmem:[%s475_s5 + $0x8] sm:$0x3]  ;;  %v287_v32 = vand.u32 127, %v286_v31 }
   0x4   :  { %361 = vmatpush3.bf16.msra.mxu0 %v360_v5  ;;  %v366_v11 = vpack.c.bf16 %v114_v10, %v113_v9  ;;  %v315_v13 = vld [vmem:[%s474_s2] ss:$0 sm:$0xff] }
   0x5   :  { %362 = vmatprep.subr.bf16.mxu0 %v377_v0  ;;  %v201_v18 = vld [vmem:[%s475_s5] sm:$0xff] }
   0x6   :  { %368 = vmatpush3.bf16.msk.msra.mxu1 %vm444_vm4, %v366_v11  ;;  %v370_v20 = vpack.c.bf16 %v202_v19, %v201_v18  ;;  %v317_v21 = vld [vmem:[%s476_s4] ss:$0 sm:$0xff] }
   0x7   :  { %369 = vmatprep.subr.bf16.mxu1 %v377_v0  ;;  %v320_v26 = vld [vmem:[%s477_s6] ss:$0 sm:$0xff] }
   0x8   :  { %364 = vmatpush3.bf16.msra.mxu0 %v363_v7 }
   0xb   :  { %343 = vmatmul.mubr.msk.f32.vlgmr.msra.gmra.mrb[0].mxu0 %vm38_vm1, %v26_v8 }
  0xde   :  { %v108_v14 = vpop.f32.mrb[0].mxu0 }
  0xdf   :  { %v109_v15 = vadd.f32 %v315_v13, %v108_v14  ;;  %v344_v16 = vpop.f32.mrb[1].mxu0 }
  0xe1   :  { %v112_v17 = vmax.f32 %v109_v15, 0.0 }
  0xe3   :  { %350 = vmatmul.mubr.msk.f32.vlgmr.msra.gmra.mrb[0].mxu1 %vm122_vm5, %v112_v17 }
  0xe4   :  { %356 = vmatprep.mubr.msk.f32.mxu1 %vm378_vm0, %v379_v4  ;;  %372 = vmatpush3.bf16.msk.msra.mxu1 %vm444_vm4, %v370_v20 }
 0x1b6   :  { %v196_v22 = vpop.f32.mrb[0].mxu1 }
 0x1b7   :  { %v197_v23 = vadd.f32 %v317_v21, %v196_v22  ;;  %v351_v24 = vpop.f32.mrb[1].mxu1 }
 0x1b9   :  { %v200_v25 = vmax.f32 %v197_v23, 0.0 }
 0x1bb   :  { %357 = vmatmul.mubr.msk.f32.vlgmr.msra.gmra.mrb[2].mxu1 %vm122_vm5, %v200_v25 }
 0x28e   :  { %v282_v27 = vpop.f32.mrb[2].mxu1 }
 0x28f   :  { %v283_v28 = vadd.f32 %v320_v26, %v282_v27  ;;  %v358_v29 = vpop.f32.mrb[3].mxu1 }
 0x291   :  { %v289_v30 = vsel %vm288_vm6, %v283_v28, -inf }
 0x292   :  { %290 = vmax.xlane.f32.xlu0 %v289_v30 }
 0x31f   :  { %v291_v33 = vpop.xlane.xlu0 %290 }
 0x320   :  { %vm292_vm7 = vcmp.eq.f32.partialorder %v283_v28, %v291_v33 }
 0x321   :  { %v293_v34 = vsel %vm292_vm7, %v287_v32, 5 }
 0x322   :  { %v294_v35 = vsel %vm288_vm6, %v293_v34, 2147483647 }
 0x323   :  { %v296_v36 = vshra.s32 %v294_v35, 16  ;;  %v295_v38 = vand.u32 65535, %v294_v35 }
 0x325   :  { %v298_v37 = vcvt.s32.f32 %v296_v36  ;;  %v297_v40 = vcvt.s32.f32 %v295_v38 }
 0x327   :  { %299 = vmin.xlane.f32.xlu0 %v298_v37 }
 0x3b4   :  { %v300_v39 = vpop.xlane.xlu0 %299 }
 0x3b5   :  { %vm301_vm8 = vcmp.eq.f32.partialorder %v298_v37, %v300_v39  ;;  %v306_v42 = vcvt.f32.s32 %v300_v39 }
 0x3b6   :  { %v302_v41 = vsel %vm301_vm8, %v297_v40, inf }
 0x3b7   :  { %303 = vmin.xlane.f32.xlu1 %v302_v41  ;;  %v307_v44 = vshll.u32 %v306_v42, 16 }
 0x444   :  { %v304_v43 = vpop.xlane.xlu1 %303 }
 0x445   :  { %v305_v45 = vcvt.f32.s32 %v304_v43 }
 0x447   :  { %v308_v46 = vadd.s32 %v307_v44, %v305_v45 }
 0x449   :  { %310 = vst.msk [vmem:[%s478_s7] sm:$0xff] %vm309_vm9, %v308_v46 }

</bundles_post_ra>
